<compile_context>
chip_gen: v5e
topology: v5e:2x2
jax: 0.10.0
libtpu: 0.0.40
codegen_flags: <defaults>
</compile_context>

<pallas_src>
import math
from functools import partial

import jax
import jax.numpy as jnp
import numpy as np
from jax.experimental import pallas as pl
from jax.experimental.pallas import tpu as pltpu


# ---------------------------------------------------------------------------
# Kernel
# ---------------------------------------------------------------------------
def linear_kernel(x_ref, w_ref, b_ref, o_ref, *, compute_dtype):
    """One (i, j, k) grid step of  y[i, j] += x[i, k] @ w[k, j]  (+ bias).

    The output block's index_map ignores k, so it stays resident in VMEM
    across the whole K chain and doubles as the f32 accumulator -- no scratch
    buffer and no final accumulator->output copy are needed.
    """
    @pl.when(pl.program_id(2) == 0)
    def _init():
        # Fold the bias add into the accumulator init: saves a zero-fill pass
        # and the last-step bias add/branch.
        o_ref[...] = jnp.broadcast_to(b_ref[...], o_ref.shape)

    # Weights arrive pre-transposed as (K, N): plain MXU matmul, no transpose.
    # Tile-wise cast (VPU) enables the bf16 MXU path while keeping x in HBM/
    # VMEM at its original dtype; it is a no-op on the pure-f32 path.
    o_ref[...] += jnp.dot(
        x_ref[...].astype(compute_dtype),
        w_ref[...].astype(compute_dtype),
        preferred_element_type=jnp.float32,
    )


# ---------------------------------------------------------------------------
# Wrapper helpers
# ---------------------------------------------------------------------------
def _cdiv(a, b):
    return -(-a // b)


def _round_up(v, m):
    return _cdiv(v, m) * m


def _tpu_generation():
    """Best-effort TPU generation from device_kind; 0 if unknown."""
    try:
        kind = jax.devices()[0].device_kind.lower()
    except Exception:
        return 0
    for g in (7, 6, 5, 4):
        if f"v{g}" in kind:
            return g
    return 0


def _pick_tile(dim, cap, align):
    """Return (tile, padded_dim).

    Full-extent tile when dim <= cap (zero padding, no (8,128) constraint);
    otherwise the fewest blocks that fit under `cap`, with the tile hugging
    `dim` (rounded up to `align`) so padding waste stays minimal.
    """
    if dim <= cap:
        return dim, dim
    nblk = _cdiv(dim, cap)
    t = min(cap, _round_up(_cdiv(dim, nblk), align))
    return t, _round_up(dim, t)


def prepare_weight(weight_nk, compute_dtype=jnp.float32):
    """One-time (parameter-init-time) transform of the PyTorch-layout
    (out_features, in_features) weight into the kernel's (K, N) layout and
    compute dtype.  Do this once per parameter, not per forward.  Pass
    jnp.bfloat16 for the fast MXU path on v6e/v7x (f32 accumulation and the
    f32 bias add are kept inside the kernel)."""
    return jnp.asarray(weight_nk).T.astype(compute_dtype)


# ---------------------------------------------------------------------------
# Forward
# ---------------------------------------------------------------------------
def linear_forward(x, w_kn, bias, *, tm=None, tn=None, tk=None):
    """y = x @ W^T + bias, with W supplied pre-transposed as w_kn = W.T (K, N).

    Output is always float32 (accumulation and bias add in f32); the MXU
    compute dtype is w_kn.dtype (float32 = exact module semantics, bfloat16 =
    fast path)."""
    M, K = x.shape
    Kw, N = w_kn.shape
    assert K == Kw, "in_features mismatch"
    assert bias.shape == (N,), "bias shape mismatch"
    compute_dtype = w_kn.dtype

    gen = _tpu_generation()
    is_v7 = gen == 7

    # Per-generation tile caps: 128 MiB-VMEM chips (v5e/v6e) take bigger K
    # blocks to amortise the ~0.35us/step overhead and cut weight
    # re-streaming; v7x (64 MiB VMEM) stays tighter.
    tm_cap, tn_cap = 512, 1024
    tk_cap = 2048 if gen in (5, 6) else 1024

    auto_mn = tm is None and tn is None
    if tm is None:
        tm, Mp = _pick_tile(M, tm_cap, 8)
        if gen in (6, 7):                               # 256-wide MXU: prefer
            tm2, Mp2 = _pick_tile(M, tm_cap, 256)       # 256-aligned tiles when
            if Mp2 <= Mp:                               # it costs no extra pad.
                tm, Mp = tm2, Mp2
    else:
        Mp = _round_up(M, tm)
    if tn is None:
        tn, Np = _pick_tile(N, tn_cap, 128)
        if gen in (6, 7):
            tn2, Np2 = _pick_tile(N, tn_cap, 256)
            if Np2 <= Np:
                tn, Np = tn2, Np2
    else:
        Np = _round_up(N, tn)
    if tk is None:
        tk, Kp = _pick_tile(K, tk_cap, 128)
    else:
        Kp = _round_up(K, tk)

    # Megacore split: only v7x has 2 TensorCores.  If the whole problem is a
    # single (i, j) block, split one parallel axis so the second core works.
    if is_v7 and auto_mn and (Mp // tm) * (Np // tn) == 1:
        if tn % 256 == 0:
            tn //= 2            # still a multiple of 128, still divides Np
        elif tm % 16 == 0:
            tm //= 2            # still a multiple of 8, still divides Mp

    # Pad only when a blocked dim genuinely doesn't divide.  K padding is
    # required for reduction correctness (zero-fill); M/N padding is sliced
    # off the output.  Small dims use full-extent blocks -> no padding at all.
    if (Mp, Kp) != (M, K):
        x = jnp.pad(x, ((0, Mp - M), (0, Kp - K)))
    if (Kp, Np) != (K, N):
        w_kn = jnp.pad(w_kn, ((0, Kp - K), (0, Np - N)))
    b2 = bias.astype(jnp.float32)
    if Np != N:
        b2 = jnp.pad(b2, (0, Np - N))
    b2 = b2.reshape(1, Np)

    g_m, g_n, g_k = Mp // tm, Np // tn, Kp // tk
    grid = (g_m, g_n, g_k)

    # Skinny-M (decode-like) shapes are weight-streaming bound: 3-deep
    # buffering on the streamed operands keeps HBM DMA from being exposed.
    deep = Mp <= 64 and g_k >= 3
    stream_kw = {"pipeline_mode": pl.Buffered(3)} if deep else {}
    x_spec = pl.BlockSpec((tm, tk), lambda i, j, k: (i, k), **stream_kw)
    w_spec = pl.BlockSpec((tk, tn), lambda i, j, k: (k, j), **stream_kw)
    b_spec = pl.BlockSpec((1, tn), lambda i, j, k: (0, j))
    o_spec = pl.BlockSpec((tm, tn), lambda i, j, k: (i, j))

    # Scoped-VMEM limit derived from the actual tile footprint (no blanket
    # 32 MiB floor), clamped under physical VMEM (64 MiB v7x / 128 MiB else).
    xe, we = x.dtype.itemsize, w_kn.dtype.itemsize
    nbuf = 3 if deep else 2
    tile_bytes = (nbuf * tm * tk * xe        # streamed x tiles
                  + nbuf * tk * tn * we      # streamed weight tiles
                  + 2 * tm * tn * 4          # resident/double-buffered f32 out
                  + 2 * tn * 4)              # bias tile
    vmem_cap = (56 << 20) if is_v7 else (100 << 20)
    vmem_limit = int(min(vmem_cap, max(tile_bytes * 3 // 2 + (2 << 20), 16 << 20)))

    # Advisory cost with real re-streaming traffic (W read g_m times, x read
    # g_n times) on padded dims, so XLA schedules neighbouring ops sensibly.
    cost = pl.CostEstimate(
        flops=2 * Mp * Np * Kp,
        transcendentals=0,
        bytes_accessed=(Mp * Kp * xe) * g_n + (Kp * Np * we) * g_m
        + Mp * Np * 4 + Np * 4,
    )

    out = pl.pallas_call(
        partial(linear_kernel, compute_dtype=compute_dtype),
        out_shape=jax.ShapeDtypeStruct((Mp, Np), jnp.float32),
        grid_spec=pltpu.PrefetchScalarGridSpec(
            num_scalar_prefetch=0,
            grid=grid,
            in_specs=[x_spec, w_spec, b_spec],
            out_specs=o_spec,
        ),
        compiler_params=pltpu.CompilerParams(
            dimension_semantics=("parallel", "parallel", "arbitrary"),
            vmem_limit_bytes=vmem_limit,
        ),
        cost_estimate=cost,
    )(x, w_kn, b2)

    if (Mp, Np) != (M, N):
        out = out[:M, :N]
    return out
    # TODO(synk): optional v7x fp8 weight-streaming path (fp8 weights +
    # in-kernel dequant, f32 accumulate) for memory-bound decode shapes.


# ---------------------------------------------------------------------------
# Self-test
# ---------------------------------------------------------------------------
if __name__ == "__main__":
    key = jax.random.PRNGKey(0)
    kx, kw, kb, kx2, kw2 = jax.random.split(key, 5)

    def ref_fp64(x, w_nk, b):
        return (np.asarray(x, np.float64) @ np.asarray(w_nk, np.float64).T
                + np.asarray(b, np.float64))

    # --- small shapes matching the module: (batch, in) x (out, in) ----------
    batch, in_features, out_features = 8, 32, 64
    weight = jax.random.normal(kw, (out_features, in_features), jnp.float32) \
        * math.sqrt(2.0 / in_features)
    bias = jnp.zeros((out_features,), jnp.float32)
    x = jax.random.normal(kx, (batch, in_features), jnp.float32)

    w_kn = prepare_weight(weight, jnp.float32)          # init-time (K, N) layout
    y = jax.block_until_ready(linear_forward(x, w_kn, bias))
    assert y.shape == (batch, out_features) and y.dtype == jnp.float32
    # Loose-ish tolerance: covers any bf16-pass decomposition of the f32 MXU
    # path while still catching layout / bias / tiling bugs (errors would be O(1)).
    assert np.allclose(np.asarray(y), ref_fp64(x, weight, bias),
                       atol=2e-2, rtol=2e-2), "f32 path mismatch (small)"

    # --- larger shape exercising K-reduction grid, padding, output slicing ---
    M2, K2, N2 = 300, 320, 384
    w2 = jax.random.normal(kw2, (N2, K2), jnp.float32) * math.sqrt(2.0 / K2)
    b2 = 0.1 * jax.random.normal(kb, (N2,), jnp.float32)
    x2 = jax.random.normal(kx2, (M2, K2), jnp.float32)
    ref2 = ref_fp64(x2, w2, b2)

    y2 = jax.block_until_ready(
        linear_forward(x2, prepare_weight(w2, jnp.float32), b2,
                       tm=128, tn=128, tk=128))
    assert y2.shape == (M2, N2)
    assert np.allclose(np.asarray(y2), ref2, atol=2e-2, rtol=2e-2), \
        "f32 path mismatch (tiled/padded)"

    # --- bf16 compute path (f32 accumulation + f32 bias): v6e/v7x fast path --
    y2_bf = jax.block_until_ready(
        linear_forward(x2, prepare_weight(w2, jnp.bfloat16), b2))
    assert y2_bf.dtype == jnp.float32
    rel = np.max(np.abs(np.asarray(y2_bf, np.float64) - ref2)) / np.max(np.abs(ref2))
    assert rel < 5e-2, f"bf16 path relative error too large: {rel}"

    print("KERNEL_OK")
</pallas_src>

<mosaic_0001>
module attributes {stable_mosaic.version = 11 : i64} {
  func.func @linear_kernel(%arg0: i32, %arg1: i32, %arg2: i32, %arg3: memref<8x32xf32, #tpu.memory_space<vmem>>, %arg4: memref<32x64xf32, #tpu.memory_space<vmem>>, %arg5: memref<1x64xf32, #tpu.memory_space<vmem>>, %arg6: memref<8x64xf32, #tpu.memory_space<vmem>>) attributes {dimension_semantics = [#tpu.dimension_semantics<parallel>, #tpu.dimension_semantics<parallel>, #tpu.dimension_semantics<arbitrary>], iteration_bounds = array<i64: 1, 1, 1>, scalar_prefetch = 0 : i64, scratch_operands = 0 : i64, tpu.core_type = #tpu.core_type<tc>, window_params = [{transform_indices = @transform_0, window_bounds = array<i64: 8, 32>}, {transform_indices = @transform_1, window_bounds = array<i64: 32, 64>}, {transform_indices = @transform_2, window_bounds = array<i64: 1, 64>}, {transform_indices = @transform_3, window_bounds = array<i64: 8, 64>}]} {
    %c0_i32 = arith.constant 0 : i32
    %0 = arith.cmpi eq, %arg2, %c0_i32 : i32
    %1 = arith.extui %0 : i1 to i32
    %c0_i32_0 = arith.constant 0 : i32
    %2 = arith.cmpi ne, %1, %c0_i32_0 : i32
    scf.if %2 {
      %c0_8 = arith.constant 0 : index
      %c0_9 = arith.constant 0 : index
      %9 = vector.load %arg5[%c0_8, %c0_9] : memref<1x64xf32, #tpu.memory_space<vmem>>, vector<1x64xf32>
      %10 = vector.shape_cast %9 : vector<1x64xf32> to vector<1x64xf32>
      %11 = vector.broadcast %10 : vector<1x64xf32> to vector<8x64xf32>
      %c0_10 = arith.constant 0 : index
      %c0_11 = arith.constant 0 : index
      %12 = vector.load %arg6[%c0_10, %c0_11] : memref<8x64xf32, #tpu.memory_space<vmem>>, vector<8x64xf32>
      tpu.vector_store %arg6[%c0_10, %c0_11], %11 {strides = array<i32>} : memref<8x64xf32, #tpu.memory_space<vmem>>, vector<8x64xf32>,
    } else {
    }
    %c0 = arith.constant 0 : index
    %c0_1 = arith.constant 0 : index
    %3 = vector.load %arg6[%c0, %c0_1] : memref<8x64xf32, #tpu.memory_space<vmem>>, vector<8x64xf32>
    %c0_2 = arith.constant 0 : index
    %c0_3 = arith.constant 0 : index
    %4 = vector.load %arg3[%c0_2, %c0_3] : memref<8x32xf32, #tpu.memory_space<vmem>>, vector<8x32xf32>
    %c0_4 = arith.constant 0 : index
    %c0_5 = arith.constant 0 : index
    %5 = vector.load %arg4[%c0_4, %c0_5] : memref<32x64xf32, #tpu.memory_space<vmem>>, vector<32x64xf32>
    %cst = arith.constant dense<0.000000e+00> : vector<8x64xf32>
    %6 = tpu.matmul %4, %5, %cst {dimension_numbers = #tpu.dot_dimension_numbers<[1], [0], [0], [1], [0, 0, 1, 1], [], []>} : vector<8x32xf32>, vector<32x64xf32>, vector<8x64xf32> -> vector<8x64xf32>
    %7 = arith.addf %3, %6 : vector<8x64xf32>
    %c0_6 = arith.constant 0 : index
    %c0_7 = arith.constant 0 : index
    %8 = vector.load %arg6[%c0_6, %c0_7] : memref<8x64xf32, #tpu.memory_space<vmem>>, vector<8x64xf32>
    tpu.vector_store %arg6[%c0_6, %c0_7], %7 {strides = array<i32>} : memref<8x64xf32, #tpu.memory_space<vmem>>, vector<8x64xf32>,
    return
  }
  func.func @transform_0(%arg0: i32, %arg1: i32, %arg2: i32) -> (i32, i32) {
    %c0_i32 = arith.constant 0 : i32
    return %arg0, %arg2 : i32, i32
  }
  func.func @transform_1(%arg0: i32, %arg1: i32, %arg2: i32) -> (i32, i32) {
    %c0_i32 = arith.constant 0 : i32
    return %arg2, %arg1 : i32, i32
  }
  func.func @transform_2(%arg0: i32, %arg1: i32, %arg2: i32) -> (i32, i32) {
    %c0_i32 = arith.constant 0 : i32
    %c0_i32_0 = arith.constant 0 : i32
    return %c0_i32, %arg1 : i32, i32
  }
  func.func @transform_3(%arg0: i32, %arg1: i32, %arg2: i32) -> (i32, i32) {
    %c0_i32 = arith.constant 0 : i32
    return %arg0, %arg1 : i32, i32
  }
}

</mosaic_0001>

<bundles_post_ra>
// kernel: tpu_custom_call.1
= control target key start
LH: loop header
LB: loop body
LE: loop exit
PB: predicated region body
PF: predicated region fallthrough
CT: control target
= control target key end

     0   :  { %8 = vsyncpa [#allocation3], 0  ;;  %s230_s0 = inlined_call_operand.hbm [shape: f32[8,32], index: 0, kind: input, shape index: {}]   ;;  %s231_s1 = inlined_call_operand.hbm [shape: f32[32,64], index: 1, kind: input, shape index: {}]   ;;  %s232_s2 = inlined_call_operand.vmem [shape: f32[1,64], index: 2, kind: input, shape index: {}]   ;;  %s233_s3 = inlined_call_operand.hbm [shape: f32[8,64], index: 3, kind: output, shape index: {}]  }
   0x1   :  { %9 = vsyncpa [#allocation6], 0 }
   0x2   :  { %10 = vsyncpa [#allocation4], 0  ;;  %s16_s14 = sshll.u32 %s230_s0, 4  ;;  %s191_s15 = smov [#allocation2]   ;;  %s17_s14 = int_to_ptr.hbm [resolvable:$true] %s16_s14 }
   0x3   :  { %s18_s16 = sshll.u32 %s191_s15, 4  ;;  %s26_s19 = sshll.u32 %s231_s1, 4  ;;  %s19_s16 = int_to_ptr.vmem [resolvable:$true] %s18_s16  ;;  %s27_s19 = int_to_ptr.hbm [resolvable:$true] %s26_s19 }
   0x4   :  { %21 = dma.hbm_to_vmem [thread:$0]  %s17_s14, 128, %s19_s16, [#allocation3]  }
   0x5   :  { %s192_s20 = smov [#allocation5]   ;;  %s193_s22 = smov 128  }
   0x6   :  { %s28_s21 = sshll.u32 %s192_s20, 4  ;;  %s194_s23 = smov 8   ;;  %s29_s21 = int_to_ptr.vmem [resolvable:$true] %s28_s21 }
   0x7   :  { %34 = dma.hbm_to_vmem [thread:$0]  %s27_s19, 512, %s29_s21, [#allocation6], %s193_s22, %s193_s22, %s194_s23  }
   0x8   :  { %185 = dma.done.wait [#allocation3], 128  }
   0x9   :  { %186 = vsyncadd [#allocation3], 4294967168 }
   0xa   :  { %187 = dma.done.wait [#allocation6], 512  }
   0xb   :  { %188 = vsyncadd [#allocation6], 4294966784  ;;  %vm53_vm0 = vcmask 523264   ;;  %v112_v0 = vld [vmem:[%s232_s2] ss:$0 sm:$0xff]  ;;  %v59_v2 = vld [vmem:[#allocation5 + $0x10] sm:$0xff] }
   0xc   :  { %v60_v1 = vld [vmem:[#allocation5 + $0x18] sm:$0xff]  ;;  %54 = vst.msk [vmem:[#allocation7] sm:$0xff] %vm53_vm0, %v112_v0  ;;  %v58_v3 = vld [vmem:[#allocation5 + $0x8] sm:$0xff]  ;;  %v57_v4 = vld [vmem:[#allocation5] sm:$0xff]  ;;  %vm61_vm1 = vcmask 261120   ;;  %s195_s1 = smov [#allocation7]  }
   0xd   :  { %77 = vmatpush.msra.mxu0 %v60_v1  ;;  %v56_v5 = vld [vmem:[#allocation2] sm:$0xff]  ;;  %s93_s25 = sshll.u32 %s195_s1, 4  ;;  %s95_s2 = sshll.u32 %s233_s3, 4  ;;  %s94_s25 = int_to_ptr.vmem [resolvable:$true] %s93_s25  ;;  %s96_s2 = int_to_ptr.hbm [resolvable:$true] %s95_s2 }
   0xf   :  { %78 = vmatpush.msra.mxu0 %v59_v2 }
  0x11   :  { %79 = vmatpush.msra.mxu0 %v58_v3 }
  0x13   :  { %80 = vmatpush.msra.mxu0 %v57_v4  ;;  %v55_v6 = vld [vmem:[#allocation7] sm:$0xff] }
  0x14   :  { %106 = vmatmul.msk.f32.vlgmr.msra.gmra.mxu0 %vm61_vm1, %v56_v5 }
  0x91   :  { %v82_v7 = vpop.f32.mrf.mxu0 }
  0x92   :  { %v85_v8 = vadd.f32 %v82_v7, %v55_v6 }
  0x94   :  { %87 = vst.msk [vmem:[#allocation7] sm:$0xff] %vm53_vm0, %v85_v8 }
  0x95   :  { %98 = dma.vmem_to_hbm [thread:$0]  %s94_s25, 128, %s96_s2, [#allocation4]  }
  0x96   :  { %189 = dma.done.wait [#allocation4], 128  }
  0x97   :  { %190 = vsyncadd [#allocation4], 4294967168 }
  0x98   :  { %103 = vsyncpa [#allocation3], 1 }
  0x99   :  { %104 = vsyncpa [#allocation6], 1 }
  0x9a   :  { %105 = vsyncpa [#allocation4], 1 }

</bundles_post_ra>
